<compile_context>
chip_gen: v7x
topology: tpu7x:2x2x1
jax: 0.10.0
libtpu: 0.0.40
codegen_flags: <defaults>
</compile_context>

<pallas_src>
import jax
import jax.numpy as jnp
from jax.experimental import pallas as pl
from jax.experimental.pallas import tpu as pltpu


_MiB = 1024 * 1024
_VMEM_BUDGET = 48 * _MiB          # conservative vs v7x's 64 MiB physical VMEM
_VMEM_LIMIT_CAP = 56 * _MiB


def bn_critic_kernel(feat_ref, act_ref, w1f_ref, w1a_ref, b1_ref,
                     w2_ref, b2_ref, wv_ref, bv_ref, out_ref):
    # Stage 1: fc1 + (folded) bn1 + ReLU, split across the two concatenated inputs
    # (avoids the wrapper-side concat).  MXU matmuls in the weight dtype, f32 accumulate.
    h1 = jnp.dot(feat_ref[...], w1f_ref[...], preferred_element_type=jnp.float32)
    h1 = h1 + jnp.dot(act_ref[...], w1a_ref[...], preferred_element_type=jnp.float32)
    # Cast to the weight dtype right after ReLU so the f32 tile is not kept live into fc2.
    h1 = jnp.maximum(h1 + b1_ref[...], 0.0).astype(w2_ref.dtype)

    # Stage 2: fc2 + (folded) bn2 + ReLU (f32 accumulate).
    h2 = jnp.dot(h1, w2_ref[...], preferred_element_type=jnp.float32)
    h2 = jnp.maximum(h2 + b2_ref[...], 0.0)

    # Stage 3: value head (128 -> 1) as VPU multiply + lane reduction (XLU slot),
    # instead of an N=1 MXU matmul that would waste a full MXU push/pop.
    v = jnp.sum(h2 * wv_ref[...], axis=-1, keepdims=True)
    out_ref[...] = (v + bv_ref[...]).astype(out_ref.dtype)


def _fold_bn_into_linear(w_t, b, gamma, beta, mean, var, eps=1e-5):
    """Fold eval-mode BatchNorm1d into the preceding Linear (weights pre-transposed (in,out))."""
    s = gamma / jnp.sqrt(var + eps)               # per-output-channel scale
    return w_t * s[None, :], (b - mean) * s + beta


def prepare_kernel_params(params, weights_dtype=jnp.bfloat16):
    """Fold BN, split fc1 weight into feature/action parts, cast, reshape biases."""
    (w1_t, b1, g1, be1, m1, v1,
     w2_t, b2, g2, be2, m2, v2,
     wv_t, bv) = params

    w1_full, b1f = _fold_bn_into_linear(w1_t, b1, g1, be1, m1, v1)
    w2f, b2f = _fold_bn_into_linear(w2_t, b2, g2, be2, m2, v2)

    f_dim = w1_full.shape[0] - 2                   # fc1 input = flattened conv feat + 2 actions
    w1_feat = w1_full[:f_dim].astype(weights_dtype)      # (F, 256)
    w1_act = w1_full[f_dim:].astype(weights_dtype)       # (2, 256)
    w2f = w2f.astype(weights_dtype)                       # (256, 128)
    wv_row = wv_t.reshape(1, -1).astype(jnp.float32)      # (1, 128) f32 row for VPU value head
    b1f = b1f.reshape(1, -1).astype(jnp.float32)
    b2f = b2f.reshape(1, -1).astype(jnp.float32)
    bvf = bv.reshape(1, 1).astype(jnp.float32)
    return w1_feat, w1_act, b1f, w2f, b2f, wv_row, bvf


def _round_up(n, m):
    return ((n + m - 1) // m) * m


def _vmem_bytes_estimate(tb, f_dim, act_itemsize, w_itemsize):
    """Rough VMEM footprint: double-buffered input/output tiles + resident weights + intermediates."""
    inputs = 2 * tb * (f_dim + 2) * act_itemsize
    outputs = 2 * tb * 1 * 4
    weights = ((f_dim + 2) * 256 + 256 * 128) * w_itemsize + (256 + 128 + 128 + 1) * 4
    inter = tb * 256 * 4 + tb * 256 * w_itemsize + 2 * tb * 128 * 4
    return inputs + outputs + weights + inter


def bn_critic_forward(conv_features, action, params, *,
                      tile_b=512, weights_dtype=jnp.bfloat16):
    """conv_features: (B, fc1_input_size) output of conv_net; action: (B, 2).
    Returns value: (B, 1) float32."""
    B = conv_features.shape[0]
    feat = conv_features.reshape(B, -1)
    f_dim = feat.shape[1]

    w1_feat, w1_act, b1f, w2f, b2f, wv_row, bvf = prepare_kernel_params(params, weights_dtype)
    assert w1_feat.shape[0] == f_dim, "conv feature size does not match fc1_input_size"

    # Stream activations at the MXU input dtype (halves input DMA when bf16).
    act_dtype = weights_dtype
    feat = feat.astype(act_dtype)
    act = action.astype(act_dtype)
    act_itemsize = jnp.dtype(act_dtype).itemsize
    w_itemsize = jnp.dtype(weights_dtype).itemsize

    # --- batch tile selection -------------------------------------------------
    tb = min(tile_b, _round_up(B, 8))
    tb = max(8, _round_up(tb, 8))
    # Prefer >=2 grid steps when the batch allows, so the "parallel" axis feeds both v7x TCs.
    if B > 8 and pl.cdiv(B, tb) < 2:
        tb = max(8, _round_up(pl.cdiv(B, 2), 8))
    # Shrink to fit a conservative VMEM budget (covers v7x 64 MiB physical).
    while tb > 8 and _vmem_bytes_estimate(tb, f_dim, act_itemsize, w_itemsize) > _VMEM_BUDGET:
        tb = max(8, _round_up(tb // 2, 8))
    n_tiles = pl.cdiv(B, tb)   # ragged last tile handled by Pallas masking; no jnp.pad

    est = _vmem_bytes_estimate(tb, f_dim, act_itemsize, w_itemsize)
    vmem_limit = int(min(_VMEM_LIMIT_CAP, max(32 * _MiB, 2 * est)))

    weight_bytes = ((f_dim + 2) * 256 + 256 * 128) * w_itemsize + (256 + 128 + 128 + 1) * 4
    cost = pl.CostEstimate(
        flops=2 * B * ((f_dim + 2) * 256 + 256 * 128 + 128),
        transcendentals=0,
        bytes_accessed=B * (f_dim + 2) * act_itemsize + weight_bytes + B * 4,
    )

    out = pl.pallas_call(
        bn_critic_kernel,
        out_shape=jax.ShapeDtypeStruct((B, 1), jnp.float32),
        grid=(n_tiles,),
        in_specs=[
            pl.BlockSpec((tb, f_dim), lambda i: (i, 0)),       # conv feature tile (double-buffered)
            pl.BlockSpec((tb, 2), lambda i: (i, 0)),           # action tile
            pl.BlockSpec(w1_feat.shape, lambda i: (0, 0)),     # fc1/bn1 folded weight, feat part (resident)
            pl.BlockSpec(w1_act.shape, lambda i: (0, 0)),      # fc1/bn1 folded weight, action part
            pl.BlockSpec(b1f.shape, lambda i: (0, 0)),
            pl.BlockSpec(w2f.shape, lambda i: (0, 0)),         # fc2/bn2 folded weight (resident)
            pl.BlockSpec(b2f.shape, lambda i: (0, 0)),
            pl.BlockSpec(wv_row.shape, lambda i: (0, 0)),      # value head row (VPU reduction)
            pl.BlockSpec(bvf.shape, lambda i: (0, 0)),
        ],
        out_specs=pl.BlockSpec((tb, 1), lambda i: (i, 0)),
        compiler_params=pltpu.CompilerParams(
            dimension_semantics=("parallel",),                 # shard batch tiles across v7x TCs
            vmem_limit_bytes=vmem_limit,
        ),
        cost_estimate=cost,
    )(feat, act, w1_feat, w1_act, b1f, w2f, b2f, wv_row, bvf)

    return out


def init_params(key, fc1_input_size, h1=256, h2=128):
    """Torch-like Linear init (U(-1/sqrt(fan_in), +)) plus non-trivial BN running stats."""
    in1 = fc1_input_size + 2
    ks = jax.random.split(key, 16)
    bd1 = 1.0 / jnp.sqrt(jnp.float32(in1))
    bd2 = 1.0 / jnp.sqrt(jnp.float32(h1))
    bd3 = 1.0 / jnp.sqrt(jnp.float32(h2))
    # Linear weights stored pre-transposed as (in, out) for x @ W.
    w1_t = jax.random.uniform(ks[0], (in1, h1), jnp.float32, -bd1, bd1)
    b1 = jax.random.uniform(ks[1], (h1,), jnp.float32, -bd1, bd1)
    w2_t = jax.random.uniform(ks[2], (h1, h2), jnp.float32, -bd2, bd2)
    b2 = jax.random.uniform(ks[3], (h2,), jnp.float32, -bd2, bd2)
    wv_t = jax.random.uniform(ks[4], (h2, 1), jnp.float32, -bd3, bd3)
    bv = jax.random.uniform(ks[5], (1,), jnp.float32, -bd3, bd3)
    # BatchNorm1d affine params + running stats (eval mode), independent keys.
    g1 = 1.0 + 0.1 * jax.random.normal(ks[6], (h1,), jnp.float32)
    be1 = 0.1 * jax.random.normal(ks[7], (h1,), jnp.float32)
    m1 = 0.1 * jax.random.normal(ks[8], (h1,), jnp.float32)
    v1 = 1.0 + 0.1 * jax.random.uniform(ks[9], (h1,), jnp.float32)
    g2 = 1.0 + 0.1 * jax.random.normal(ks[10], (h2,), jnp.float32)
    be2 = 0.1 * jax.random.normal(ks[11], (h2,), jnp.float32)
    m2 = 0.1 * jax.random.normal(ks[12], (h2,), jnp.float32)
    v2 = 1.0 + 0.1 * jax.random.uniform(ks[13], (h2,), jnp.float32)
    return (w1_t, b1, g1, be1, m1, v1,
            w2_t, b2, g2, be2, m2, v2,
            wv_t, bv)


def reference_eval(conv_features, action, params, eps=1e-5):
    """Pure-JAX eval-mode reference with explicit (unfolded) BatchNorm, all f32."""
    (w1_t, b1, g1, be1, m1, v1,
     w2_t, b2, g2, be2, m2, v2,
     wv_t, bv) = params
    x = jnp.concatenate(
        [conv_features.reshape(conv_features.shape[0], -1), action], axis=1)
    h = x @ w1_t + b1
    h = g1 * (h - m1) / jnp.sqrt(v1 + eps) + be1
    h = jnp.maximum(h, 0.0)
    h = h @ w2_t + b2
    h = g2 * (h - m2) / jnp.sqrt(v2 + eps) + be2
    h = jnp.maximum(h, 0.0)
    return h @ wv_t + bv


def reference_folded(conv_features, action, params, weights_dtype):
    """Reference using the exact folded/split/cast parameters fed to the kernel."""
    w1_feat, w1_act, b1f, w2f, b2f, wv_row, bvf = prepare_kernel_params(params, weights_dtype)
    B = conv_features.shape[0]
    feat = conv_features.reshape(B, -1).astype(w1_feat.dtype)
    act = action.astype(w1_act.dtype)
    h = (jnp.dot(feat, w1_feat, preferred_element_type=jnp.float32)
         + jnp.dot(act, w1_act, preferred_element_type=jnp.float32))
    h = jnp.maximum(h + b1f, 0.0).astype(w2f.dtype)
    h = jnp.maximum(jnp.dot(h, w2f, preferred_element_type=jnp.float32) + b2f, 0.0)
    return jnp.sum(h * wv_row, axis=-1, keepdims=True) + bvf


if __name__ == "__main__":
    key = jax.random.PRNGKey(0)
    kf, ka, kp, kf2, ka2 = jax.random.split(key, 5)

    batch = 8
    fc1_input_size = 32        # flattened conv_net output size

    conv_features = jax.random.normal(kf, (batch, fc1_input_size), dtype=jnp.float32)
    action = jax.random.normal(ka, (batch, 2), dtype=jnp.float32)
    params = init_params(kp, fc1_input_size)

    # 1) f32-weight kernel vs explicit-BN reference (validates BN folding + split-concat wiring).
    v_f32 = bn_critic_forward(conv_features, action, params, weights_dtype=jnp.float32)
    jax.block_until_ready(v_f32)
    ref = reference_eval(conv_features, action, params)
    assert v_f32.shape == (batch, 1)
    assert jnp.allclose(v_f32, ref, atol=1e-4, rtol=1e-4), "f32 kernel mismatch"

    # 2) bf16-activation/weight kernel (deployment config) vs bf16 folded reference + loose f32 check.
    v_bf16 = bn_critic_forward(conv_features, action, params, weights_dtype=jnp.bfloat16)
    jax.block_until_ready(v_bf16)
    ref_bf16 = reference_folded(conv_features, action, params, jnp.bfloat16)
    assert jnp.allclose(v_bf16, ref_bf16, atol=2e-3, rtol=2e-3), "bf16 kernel mismatch"
    assert jnp.allclose(v_bf16, ref, atol=5e-2, rtol=5e-2), "bf16 kernel drifted from f32 ref"

    # 3) Non-multiple batch: exercises >=2 grid steps (megacore path) and the ragged
    #    (masked) last tile with no wrapper-side padding.
    batch2 = 20
    cf2 = jax.random.normal(kf2, (batch2, fc1_input_size), dtype=jnp.float32)
    ac2 = jax.random.normal(ka2, (batch2, 2), dtype=jnp.float32)
    v2 = bn_critic_forward(cf2, ac2, params, weights_dtype=jnp.float32)
    jax.block_until_ready(v2)
    ref2 = reference_eval(cf2, ac2, params)
    assert v2.shape == (batch2, 1)
    assert jnp.allclose(v2, ref2, atol=1e-4, rtol=1e-4), "ragged-batch kernel mismatch"

    print("KERNEL_OK")
</pallas_src>

<mosaic_0001>
module attributes {stable_mosaic.version = 11 : i64} {
  func.func @bn_critic_kernel(%arg0: i32, %arg1: memref<8x32xf32, #tpu.memory_space<vmem>>, %arg2: memref<8x2xf32, #tpu.memory_space<vmem>>, %arg3: memref<32x256xf32, #tpu.memory_space<vmem>>, %arg4: memref<2x256xf32, #tpu.memory_space<vmem>>, %arg5: memref<1x256xf32, #tpu.memory_space<vmem>>, %arg6: memref<256x128xf32, #tpu.memory_space<vmem>>, %arg7: memref<1x128xf32, #tpu.memory_space<vmem>>, %arg8: memref<1x128xf32, #tpu.memory_space<vmem>>, %arg9: memref<1x1xf32, #tpu.memory_space<vmem>>, %arg10: memref<8x1xf32, #tpu.memory_space<vmem>>) attributes {dimension_semantics = [#tpu.dimension_semantics<parallel>], iteration_bounds = array<i64: 1>, scalar_prefetch = 0 : i64, scratch_operands = 0 : i64, tpu.core_type = #tpu.core_type<tc>, window_params = [{transform_indices = @transform_0, window_bounds = array<i64: 8, 32>}, {transform_indices = @transform_1, window_bounds = array<i64: 8, 2>}, {pipeline_mode = #tpu.pipeline_mode<synchronous>, transform_indices = @transform_2, window_bounds = array<i64: 32, 256>}, {pipeline_mode = #tpu.pipeline_mode<synchronous>, transform_indices = @transform_3, window_bounds = array<i64: 2, 256>}, {pipeline_mode = #tpu.pipeline_mode<synchronous>, transform_indices = @transform_4, window_bounds = array<i64: 1, 256>}, {pipeline_mode = #tpu.pipeline_mode<synchronous>, transform_indices = @transform_5, window_bounds = array<i64: 256, 128>}, {pipeline_mode = #tpu.pipeline_mode<synchronous>, transform_indices = @transform_6, window_bounds = array<i64: 1, 128>}, {pipeline_mode = #tpu.pipeline_mode<synchronous>, transform_indices = @transform_7, window_bounds = array<i64: 1, 128>}, {pipeline_mode = #tpu.pipeline_mode<synchronous>, transform_indices = @transform_8, window_bounds = array<i64: 1, 1>}, {transform_indices = @transform_9, window_bounds = array<i64: 8, 1>}]} {
    %c0 = arith.constant 0 : index
    %c0_0 = arith.constant 0 : index
    %0 = vector.load %arg1[%c0, %c0_0] : memref<8x32xf32, #tpu.memory_space<vmem>>, vector<8x32xf32>
    %c0_1 = arith.constant 0 : index
    %c0_2 = arith.constant 0 : index
    %1 = vector.load %arg3[%c0_1, %c0_2] : memref<32x256xf32, #tpu.memory_space<vmem>>, vector<32x256xf32>
    %cst = arith.constant dense<0.000000e+00> : vector<8x256xf32>
    %2 = tpu.matmul %0, %1, %cst {dimension_numbers = #tpu.dot_dimension_numbers<[1], [0], [0], [1], [0, 0, 1, 1], [], []>} : vector<8x32xf32>, vector<32x256xf32>, vector<8x256xf32> -> vector<8x256xf32>
    %c0_3 = arith.constant 0 : index
    %c0_4 = arith.constant 0 : index
    %3 = vector.load %arg2[%c0_3, %c0_4] : memref<8x2xf32, #tpu.memory_space<vmem>>, vector<8x2xf32>
    %c0_5 = arith.constant 0 : index
    %c0_6 = arith.constant 0 : index
    %4 = vector.load %arg4[%c0_5, %c0_6] : memref<2x256xf32, #tpu.memory_space<vmem>>, vector<2x256xf32>
    %cst_7 = arith.constant dense<0.000000e+00> : vector<8x256xf32>
    %5 = tpu.matmul %3, %4, %cst_7 {dimension_numbers = #tpu.dot_dimension_numbers<[1], [0], [0], [1], [0, 0, 1, 1], [], []>} : vector<8x2xf32>, vector<2x256xf32>, vector<8x256xf32> -> vector<8x256xf32>
    %6 = arith.addf %2, %5 : vector<8x256xf32>
    %c0_8 = arith.constant 0 : index
    %c0_9 = arith.constant 0 : index
    %7 = vector.load %arg5[%c0_8, %c0_9] : memref<1x256xf32, #tpu.memory_space<vmem>>, vector<1x256xf32>
    %8 = vector.broadcast %7 : vector<1x256xf32> to vector<8x256xf32>
    %9 = arith.addf %6, %8 : vector<8x256xf32>
    %cst_10 = arith.constant 0.000000e+00 : f32
    %10 = vector.broadcast %cst_10 : f32 to vector<8x256xf32>
    %11 = arith.maximumf %9, %10 : vector<8x256xf32>
    %c0_11 = arith.constant 0 : index
    %c0_12 = arith.constant 0 : index
    %12 = vector.load %arg6[%c0_11, %c0_12] : memref<256x128xf32, #tpu.memory_space<vmem>>, vector<256x128xf32>
    %cst_13 = arith.constant dense<0.000000e+00> : vector<8x128xf32>
    %13 = tpu.matmul %11, %12, %cst_13 {dimension_numbers = #tpu.dot_dimension_numbers<[1], [0], [0], [1], [0, 0, 1, 1], [], []>} : vector<8x256xf32>, vector<256x128xf32>, vector<8x128xf32> -> vector<8x128xf32>
    %c0_14 = arith.constant 0 : index
    %c0_15 = arith.constant 0 : index
    %14 = vector.load %arg7[%c0_14, %c0_15] : memref<1x128xf32, #tpu.memory_space<vmem>>, vector<1x128xf32>
    %15 = vector.broadcast %14 : vector<1x128xf32> to vector<8x128xf32>
    %16 = arith.addf %13, %15 : vector<8x128xf32>
    %cst_16 = arith.constant 0.000000e+00 : f32
    %17 = vector.broadcast %cst_16 : f32 to vector<8x128xf32>
    %18 = arith.maximumf %16, %17 : vector<8x128xf32>
    %c0_17 = arith.constant 0 : index
    %c0_18 = arith.constant 0 : index
    %19 = vector.load %arg8[%c0_17, %c0_18] : memref<1x128xf32, #tpu.memory_space<vmem>>, vector<1x128xf32>
    %20 = vector.broadcast %19 : vector<1x128xf32> to vector<8x128xf32>
    %21 = arith.mulf %18, %20 : vector<8x128xf32>
    %cst_19 = arith.constant dense<0.000000e+00> : vector<8xf32>
    %22 = vector.multi_reduction <add>, %21, %cst_19 [1] : vector<8x128xf32> to vector<8xf32>
    %23 = vector.shape_cast %22 : vector<8xf32> to vector<8x1xf32>
    %c0_20 = arith.constant 0 : index
    %c0_21 = arith.constant 0 : index
    %24 = vector.load %arg9[%c0_20, %c0_21] : memref<1x1xf32, #tpu.memory_space<vmem>>, vector<1x1xf32>
    %25 = vector.broadcast %24 : vector<1x1xf32> to vector<8x1xf32>
    %26 = arith.addf %23, %25 : vector<8x1xf32>
    %c0_22 = arith.constant 0 : index
    %c0_23 = arith.constant 0 : index
    %27 = vector.load %arg10[%c0_22, %c0_23] : memref<8x1xf32, #tpu.memory_space<vmem>>, vector<8x1xf32>
    tpu.vector_store %arg10[%c0_22, %c0_23], %26 {strides = array<i32>} : memref<8x1xf32, #tpu.memory_space<vmem>>, vector<8x1xf32>,
    return
  }
  func.func @transform_0(%arg0: i32) -> (i32, i32) {
    %c0_i32 = arith.constant 0 : i32
    %c0_i32_0 = arith.constant 0 : i32
    return %arg0, %c0_i32 : i32, i32
  }
  func.func @transform_1(%arg0: i32) -> (i32, i32) {
    %c0_i32 = arith.constant 0 : i32
    %c0_i32_0 = arith.constant 0 : i32
    return %arg0, %c0_i32 : i32, i32
  }
  func.func @transform_2(%arg0: i32) -> (i32, i32) {
    %c0_i32 = arith.constant 0 : i32
    %c0_i32_0 = arith.constant 0 : i32
    %c0_i32_1 = arith.constant 0 : i32
    return %c0_i32, %c0_i32_0 : i32, i32
  }
  func.func @transform_3(%arg0: i32) -> (i32, i32) {
    %c0_i32 = arith.constant 0 : i32
    %c0_i32_0 = arith.constant 0 : i32
    %c0_i32_1 = arith.constant 0 : i32
    return %c0_i32, %c0_i32_0 : i32, i32
  }
  func.func @transform_4(%arg0: i32) -> (i32, i32) {
    %c0_i32 = arith.constant 0 : i32
    %c0_i32_0 = arith.constant 0 : i32
    %c0_i32_1 = arith.constant 0 : i32
    return %c0_i32, %c0_i32_0 : i32, i32
  }
  func.func @transform_5(%arg0: i32) -> (i32, i32) {
    %c0_i32 = arith.constant 0 : i32
    %c0_i32_0 = arith.constant 0 : i32
    %c0_i32_1 = arith.constant 0 : i32
    return %c0_i32, %c0_i32_0 : i32, i32
  }
  func.func @transform_6(%arg0: i32) -> (i32, i32) {
    %c0_i32 = arith.constant 0 : i32
    %c0_i32_0 = arith.constant 0 : i32
    %c0_i32_1 = arith.constant 0 : i32
    return %c0_i32, %c0_i32_0 : i32, i32
  }
  func.func @transform_7(%arg0: i32) -> (i32, i32) {
    %c0_i32 = arith.constant 0 : i32
    %c0_i32_0 = arith.constant 0 : i32
    %c0_i32_1 = arith.constant 0 : i32
    return %c0_i32, %c0_i32_0 : i32, i32
  }
  func.func @transform_8(%arg0: i32) -> (i32, i32) {
    %c0_i32 = arith.constant 0 : i32
    %c0_i32_0 = arith.constant 0 : i32
    %c0_i32_1 = arith.constant 0 : i32
    return %c0_i32, %c0_i32_0 : i32, i32
  }
  func.func @transform_9(%arg0: i32) -> (i32, i32) {
    %c0_i32 = arith.constant 0 : i32
    %c0_i32_0 = arith.constant 0 : i32
    return %arg0, %c0_i32 : i32, i32
  }
}

</mosaic_0001>

<bundles_post_ra>
// kernel: tpu_custom_call.1
= control target key start
LH: loop header
LB: loop body
LE: loop exit
PB: predicated region body
PF: predicated region fallthrough
CT: control target
= control target key end

     0   :  { %s636_s0 = inlined_call_operand.vmem [shape: f32[8,32], index: 0, kind: input, shape index: {}]   ;;  %s637_s1 = inlined_call_operand.vmem [shape: f32[8,2], index: 1, kind: input, shape index: {}]   ;;  %s638_s2 = inlined_call_operand.hbm [shape: f32[32,256], index: 2, kind: input, shape index: {}]   ;;  %s639_s3 = inlined_call_operand.vmem [shape: f32[2,256], index: 3, kind: input, shape index: {}]   ;;  %s640_s4 = inlined_call_operand.vmem [shape: f32[1,256], index: 4, kind: input, shape index: {}]   ;;  %s641_s5 = inlined_call_operand.hbm [shape: f32[256,128], index: 5, kind: input, shape index: {}]   ;;  %s642_s6 = inlined_call_operand.vmem [shape: f32[1,128], index: 6, kind: input, shape index: {}]   ;;  %s643_s7 = inlined_call_operand.vmem [shape: f32[1,128], index: 7, kind: input, shape index: {}]   ;;  %s644_s8 = inlined_call_operand.<no memory space> [shape: f32[1,1], index: 8, kind: input, shape index: {}]   ;;  %s645_s9 = inlined_call_operand.vmem [shape: f32[8,1], index: 9, kind: output, shape index: {}]  }
   0x1   :  { %v14_v0 = vstv %s644_s8 }
   0x2   :  { %15 = vst [vmem:[#allocation2] sm:$0x1] %v14_v0 }
   0x3   :  { %16 = vsyncpa [#allocation4], 0 }
   0x4   :  { %17 = vsyncpa [#allocation6], 0  ;;  %s529_s11 = smov [#allocation3]   ;;  %s481_s15 = scalar_lea.hbm %s638_s2, 1024 }
   0x5   :  { %s27_s12 = sshll.u32 %s529_s11, 4  ;;  %p482_p0 = scmp.ne.s32.totalorder %s638_s2, %s481_s15  ;;  %s28_s12 = int_to_ptr.vmem [resolvable:$true] %s27_s12 }
   0x6   :  { %p485_p1 = scmp.lt.u32.totalorder %s481_s15, %s638_s2 }
   0x8   :  { %p487_p2 = pnand %p485_p1, %p482_p0 }
   0xa   :  { %490 = shalt.err (!%p487_p2)
}
   0xb   :  { %s491_s8 = scalar_lea.vmem %s28_s12, 1024  ;;  %p496_p4 = scmp.lt.s32.totalorder %s28_s12, %s28_s12 }
   0xc   :  { %p492_p3 = scmp.ne.s32.totalorder %s28_s12, %s491_s8  ;;  %p497_p5 = scmp.lt.s32.totalorder %s491_s8, %s491_s8 }
   0xe   :  { %p498_p6 = por %p497_p5, %p496_p4 }
  0x10   :  { %p499_p7 = pnand %p498_p6, %p492_p3 }
  0x12   :  { %502 = shalt.err (!%p499_p7)
}
  0x13   :  { %s530_s20 = smov 256   ;;  %s531_s21 = smov 16  }
  0x14   :  { %33 = dma.hbm_to_vmem [thread:$0]  %s638_s2, 1024, %s28_s12, [#allocation4], %s530_s20, %s530_s20, %s531_s21  }
  0x15   :  { %s532_s24 = smov [#allocation5]   ;;  %s503_s28 = scalar_lea.hbm %s641_s5, 4096 }
  0x16   :  { %s43_s25 = sshll.u32 %s532_s24, 4  ;;  %p504_p8 = scmp.ne.s32.totalorder %s641_s5, %s503_s28  ;;  %s44_s25 = int_to_ptr.vmem [resolvable:$true] %s43_s25 }
  0x17   :  { %p507_p9 = scmp.lt.u32.totalorder %s503_s28, %s641_s5 }
  0x19   :  { %p509_p10 = pnand %p507_p9, %p504_p8 }
  0x1b   :  { %512 = shalt.err (!%p509_p10)
}
  0x1c   :  { %s513_s13 = scalar_lea.vmem %s44_s25, 4096  ;;  %p518_p12 = scmp.lt.s32.totalorder %s44_s25, %s44_s25 }
  0x1d   :  { %p514_p11 = scmp.ne.s32.totalorder %s44_s25, %s513_s13  ;;  %p519_p13 = scmp.lt.s32.totalorder %s513_s13, %s513_s13 }
  0x1f   :  { %p520_p0 = por %p519_p13, %p518_p12 }
  0x21   :  { %p521_p1 = pnand %p520_p0, %p514_p11 }
  0x23   :  { %524 = shalt.err (!%p521_p1)
}
  0x24   :  { %s533_s2 = smov 128   ;;  %s534_s12 = smov 8  }
  0x25   :  { %49 = dma.hbm_to_vmem [thread:$0]  %s641_s5, 4096, %s44_s25, [#allocation6], %s533_s2, %s533_s2, %s534_s12  }
  0x26   :  { %525 = dma.done.wait [#allocation4], 1024  }
  0x27   :  { %526 = vsyncadd [#allocation4], 4294966272 }
  0x28   :  { %527 = dma.done.wait [#allocation6], 4096  }
  0x29   :  { %528 = vsyncadd [#allocation6], 4294963200  ;;  %v535_v1 = vmov 0.0   ;;  %vm86_vm0 = vcmask 1041408   ;;  %v64_v3 = vld [vmem:[#allocation3 + $0x8] sm:$0xff]  ;;  %v66_v5 = vld [vmem:[#allocation3 + $0x18] sm:$0xff] }
  0x2a   :  { %155 = vmatprep.mubr.f32.mxu0 %v535_v1  ;;  %v389_v2 = vld.sshfl [vmem:[%s639_s3] sm:$0x33 pattern:$0x76325410]  ;;  %v65_v7 = vld [vmem:[#allocation3 + $0x10] sm:$0xff]  ;;  %vm82_vm1 = vcmask 15360   ;;  %v432_v9 = vpack.c.bf16 %v66_v5, %v64_v3 }
  0x2b   :  { %v81_v4 = vcombine.high %v389_v2, %v389_v2  ;;  %v63_v6 = vld [vmem:[#allocation3] sm:$0xff]  ;;  %v68_v11 = vld [vmem:[#allocation3 + $0x28] sm:$0xff]  ;;  %v70_v12 = vld [vmem:[#allocation3 + $0x38] sm:$0xff]  ;;  %vm162_vm2 = vcmask 261120   ;;  %vm381_vm3 = vcmask 7168  }
  0x2c   :  { %v71_v8 = vld [vmem:[%s637_s1] sm:$0xff]  ;;  %v434_v10 = vpack.c.bf16 %v65_v7, %v63_v6  ;;  %v436_v13 = vpack.c.bf16 %v70_v12, %v68_v11  ;;  %v69_v15 = vld [vmem:[#allocation3 + $0x30] sm:$0xff]  ;;  %v270_v17 = vld [vmem:[#allocation5 + $0x88] sm:$0xff] }
  0x2d   :  { %390 = vmatprep.subr.msk.mxu0 %vm86_vm0, %v81_v4  ;;  %v67_v14 = vld [vmem:[#allocation3 + $0x20] sm:$0xff]  ;;  %v254_v19 = vld [vmem:[#allocation5 + $0x8] sm:$0xff]  ;;  %v271_v22 = vld [vmem:[#allocation5 + $0x90] sm:$0xff] }
  0x2e   :  { %v269_v16 = vld [vmem:[#allocation5 + $0x80] sm:$0xff]  ;;  %391 = vmatpush1.msk.msra.mxu0 %vm86_vm0, %v389_v2  ;;  %v272_v23 = vld [vmem:[#allocation5 + $0x98] sm:$0xff]  ;;  %v255_v24 = vld [vmem:[#allocation5 + $0x10] sm:$0xff]  ;;  %v438_v25 = vpack.c.bf16 %v69_v15, %v67_v14  ;;  %v239_v2 = vlaneseq }
  0x2f   :  { %v253_v18 = vld [vmem:[#allocation5] sm:$0xff]  ;;  %392 = vmatmul.mubr.msk.f32.vlgmr.msra.gmra.mrb[0].mxu0 %vm82_vm1, %v71_v8  ;;  %433 = vmatprep.subr.bf16.mxu0 %v432_v9  ;;  %v440_v20 = vpack.c.bf16 %v270_v17, %v269_v16  ;;  %v444_v26 = vpack.c.bf16 %v272_v23, %v271_v22  ;;  %v256_v27 = vld [vmem:[#allocation5 + $0x18] sm:$0xff]  ;;  %v274_v29 = vld [vmem:[#allocation5 + $0xa8] sm:$0xff] }
  0x30   :  { %v442_v21 = vpack.c.bf16 %v254_v19, %v253_v18  ;;  %435 = vmatpush1.bf16.msra.mxu0 %v434_v10  ;;  %230 = vmatprep.mubr.f32.mxu0 %v535_v1  ;;  %v273_v28 = vld [vmem:[#allocation5 + $0xa0] sm:$0xff]  ;;  %v446_v30 = vpack.c.bf16 %v256_v27, %v255_v24  ;;  %v258_v33 = vld [vmem:[#allocation5 + $0x28] sm:$0xff]  ;;  %v275_v35 = vld [vmem:[#allocation5 + $0xb0] sm:$0xff]  ;;  %v240_v3 = vshrl.u32 %v239_v2, 7 }
  0x31   :  { %437 = vmatprep.subr.bf16.mxu0 %v436_v13  ;;  %441 = vmatprep.subr.bf16.mxu1 %v440_v20  ;;  %v448_v31 = vpack.c.bf16 %v274_v29, %v273_v28  ;;  %v257_v32 = vld [vmem:[#allocation5 + $0x20] sm:$0xff]  ;;  %v276_v36 = vld [vmem:[#allocation5 + $0xb8] sm:$0xff]  ;;  %v259_v39 = vld [vmem:[#allocation5 + $0x30] sm:$0xff] }
  0x32   :  { %443 = vmatpush3.bf16.msra.mxu1 %v442_v21  ;;  %v62_v34 = vld [vmem:[%s636_s0] sm:$0xff]  ;;  %v450_v37 = vpack.c.bf16 %v258_v33, %v257_v32  ;;  %v452_v38 = vpack.c.bf16 %v276_v36, %v275_v35  ;;  %v278_v42 = vld [vmem:[#allocation5 + $0xc8] sm:$0xff]  ;;  %v279_v47 = vld [vmem:[#allocation5 + $0xd0] sm:$0xff]  ;;  %v241_v4 = vsub.s32 0, %v240_v3  ;;  %v245_v6 = vsub.s32 1, %v240_v3 }
  0x33   :  { %445 = vmatprep.subr.bf16.mxu1 %v444_v26  ;;  %v260_v40 = vld [vmem:[#allocation5 + $0x38] sm:$0xff]  ;;  %v277_v41 = vld [vmem:[#allocation5 + $0xc0] sm:$0xff]  ;;  %v262_v46 = vld [vmem:[#allocation5 + $0x48] sm:$0xff] }
  0x34   :  { %439 = vmatpush1.bf16.msra.mxu0 %v438_v25  ;;  %v454_v43 = vpack.c.bf16 %v260_v40, %v259_v39  ;;  %v456_v44 = vpack.c.bf16 %v278_v42, %v277_v41  ;;  %v261_v45 = vld [vmem:[#allocation5 + $0x40] sm:$0xff]  ;;  %v280_v48 = vld [vmem:[#allocation5 + $0xd8] sm:$0xff]  ;;  %v263_v51 = vld [vmem:[#allocation5 + $0x50] sm:$0xff] }
  0x35   :  { %v458_v49 = vpack.c.bf16 %v262_v46, %v261_v45  ;;  %v460_v50 = vpack.c.bf16 %v280_v48, %v279_v47  ;;  %v264_v52 = vld [vmem:[#allocation5 + $0x58] sm:$0xff]  ;;  %v281_v53 = vld [vmem:[#allocation5 + $0xe0] sm:$0xff]  ;;  %v282_v54 = vld [vmem:[#allocation5 + $0xe8] sm:$0xff] }
  0x36   :  { %447 = vmatpush3.bf16.msra.mxu1 %v446_v30  ;;  %v462_v55 = vpack.c.bf16 %v264_v52, %v263_v51  ;;  %v464_v56 = vpack.c.bf16 %v282_v54, %v281_v53  ;;  %v265_v57 = vld [vmem:[#allocation5 + $0x60] sm:$0xff]  ;;  %v266_v58 = vld [vmem:[#allocation5 + $0x68] sm:$0xff]  ;;  %v283_v60 = vld [vmem:[#allocation5 + $0xf0] sm:$0xff] }
  0x37   :  { %393 = vmatmul.mubr.msk.f32.vlgmr.msra.gmra.mrb[0].mxu0 %vm162_vm2, %v62_v34  ;;  %449 = vmatprep.subr.bf16.mxu1 %v448_v31  ;;  %v466_v59 = vpack.c.bf16 %v266_v58, %v265_v57  ;;  %v284_v61 = vld [vmem:[#allocation5 + $0xf8] sm:$0xff]  ;;  %v267_v63 = vld [vmem:[#allocation5 + $0x70] sm:$0xff] }
  0x38   :  { %v468_v62 = vpack.c.bf16 %v284_v61, %v283_v60  ;;  %v268_v0 = vld [vmem:[#allocation5 + $0x78] sm:$0xff] }
  0x39   :  { %v470_v1 = vpack.c.bf16 %v268_v0, %v267_v63  ;;  %v237_v5 = vld [vmem:[%s640_s4] sm:$0x3] }
  0x3a   :  { %451 = vmatpush3.bf16.msra.mxu1 %v450_v37  ;;  %v242_v7 = vrot.slane %v237_v5, %v241_v4  ;;  %v246_v8 = vrot.slane %v237_v5, %v245_v6  ;;  %v394_v17 = vld [vmem:[%s642_s6] ss:$0 sm:$0xff] }
  0x3b   :  { %453 = vmatprep.subr.bf16.mxu1 %v452_v38  ;;  %v395_v20 = vld [vmem:[%s643_s7] ss:$0 sm:$0xff] }
  0x3c   :  { %v396_v23 = vld [vmem:[#allocation2] ss:$0 sm:$0xff] }
  0x3e   :  { %455 = vmatpush3.bf16.msra.mxu1 %v454_v43 }
  0x3f   :  { %457 = vmatprep.subr.bf16.mxu1 %v456_v44 }
  0x42   :  { %459 = vmatpush3.bf16.msra.mxu1 %v458_v49 }
  0x43   :  { %461 = vmatprep.subr.bf16.mxu1 %v460_v50 }
  0x46   :  { %463 = vmatpush3.bf16.msra.mxu1 %v462_v55 }
  0x47   :  { %465 = vmatprep.subr.bf16.mxu1 %v464_v56 }
  0x4a   :  { %467 = vmatpush3.bf16.msra.mxu1 %v466_v59 }
  0x4b   :  { %469 = vmatprep.subr.bf16.mxu1 %v468_v62 }
  0x4e   :  { %471 = vmatpush3.bf16.msra.mxu1 %v470_v1 }
 0x10a   :  { %v232_v9 = vpop.f32.mrb[0].mxu0 }
 0x10b   :  { %v249_v10 = vadd.f32 %v242_v7, %v232_v9  ;;  %v234_v11 = vpop.f32.mrb[1].mxu0 }
 0x10c   :  { %v250_v12 = vadd.f32 %v246_v8, %v234_v11 }
 0x10d   :  { %v251_v14 = vmax.f32 %v249_v10, 0.0 }
 0x10e   :  { %v252_v13 = vmax.f32 %v250_v12, 0.0 }
 0x110   :  { %356 = vmatprep.mubr.f32.mxu1 %v252_v13 }
 0x111   :  { %357 = vmatmul.mubr.f32.vlgmr.msra.gmra.mrb[0].mxu1 %v251_v14 }
 0x1e4   :  { %v429_v15 = vpop.f32.mrb[0].mxu1 }
 0x1e5   :  { %v430_v16 = vpop.f32.mrb[1].mxu1 }
 0x1e6   :  { %v431_v18 = vadd.f32 %v430_v16, %v429_v15 }
 0x1e8   :  { %v359_v19 = vadd.f32 %v431_v18, %v394_v17 }
 0x1ea   :  { %v362_v21 = vmax.f32 %v359_v19, 0.0 }
 0x1ec   :  { %v370_v22 = vmul.f32 %v395_v20, %v362_v21 }
 0x1ee   :  { %371 = vadd.xlane.f32.xlu0 %v370_v22 }
 0x27b   :  { %v372_v24 = vpop.xlane.xlu0 %371 }
 0x27c   :  { %v380_v25 = vadd.f32 %v396_v23, %v372_v24 }
 0x27e   :  { %382 = vst.msk [vmem:[%s645_s9] sm:$0xff] %vm381_vm3, %v380_v25 }
 0x27f   :  { %387 = vsyncpa [#allocation4], 1 }
 0x280   :  { %388 = vsyncpa [#allocation6], 1 }

</bundles_post_ra>
